<compile_context>
chip_gen: v6e
topology: v6e:2x2x1
jax: 0.10.0
libtpu: 0.0.40
codegen_flags: <defaults>
</compile_context>

<pallas_src>
import functools

import jax
import jax.numpy as jnp
from jax.experimental import pallas as pl
from jax.experimental.pallas import tpu as pltpu

VMEM_SPEC = pl.BlockSpec(memory_space=pltpu.MemorySpace.VMEM)

# "NT" matmul: contract the last (lane) dim of both operands (a @ b.T) — native on the
# MXU and avoids any explicit transpose inside the kernel.
_NT_DIMS = (((1,), (1,)), ((), ()))


def _nt(a, b):
    return jax.lax.dot_general(a, b, _NT_DIMS, preferred_element_type=jnp.float32)


def _masked_softmax(weights, mask):
    """Row-wise softmax of `weights` restricted to `mask > 0` (== torch.sparse.softmax).

    Fully-masked rows produce all-zero probabilities instead of NaN.
    """
    neg = jnp.float32(-1e30)
    wm = jnp.where(mask > 0.0, weights, neg)
    wmax = jnp.max(wm, axis=-1, keepdims=True)
    e = jnp.exp(wm - wmax) * mask
    denom = jnp.sum(e, axis=-1, keepdims=True)
    inv = pl.reciprocal(jnp.maximum(denom, jnp.float32(1e-30)), approx=True)
    return e * inv


def _han_fused_kernel(x_ref, wslab_ref, struct_ref, xout_ref, xlout_ref,
                      *, n: int, e: int, c: int, cp: int, is_last: bool):
    f32 = jnp.float32
    x = x_ref[...]                                  # (N, CP) zero-padded features

    # --- unpack the single weight slab (static row slices; zero-cost ref views) -----
    w1_aug = wslab_ref[0:cp, :]                     # (CP, CP)
    b_aug = wslab_ref[cp:cp + 1, :]                 # (1, CP)
    wn_dst = wslab_ref[cp + 1:cp + 2, :]            # (1, CP)  MLP_node weight, dst half
    we_edge = wslab_ref[cp + 2:cp + 3, :]           # (1, CP)  MLP_edge weight, edge half
    gamma = wslab_ref[cp + 3:cp + 4, :]             # (1, CP)
    beta = wslab_ref[cp + 4:cp + 5, :]              # (1, CP)
    feat_mask = wslab_ref[cp + 5:cp + 6, :]         # (1, CP)  1 for real feature cols

    # --- unpack the single structure slab --------------------------------------------
    a_mask = struct_ref[0:n, 0:n]                   # (N, N)  0/1 adjacency pattern
    h = struct_ref[n:2 * n, 0:e]                    # (N, E)  incidence
    ht = struct_ref[2 * n:2 * n + e, 0:n]           # (E, N)  incidence, hyperedge-major

    # ---- 1) fused projection: one MXU push yields x_n, s_src+b_node, t_node+b_edge --
    proj = jnp.dot(x, w1_aug, preferred_element_type=f32) + b_aug      # (N, CP)
    xn = proj * feat_mask                           # (N, CP), zero beyond C
    s_src_b = proj[:, c:c + 1]                      # (N, 1): x_n·wn_src + b_node
    t_node_b = proj[:, c + 1:c + 2]                 # (N, 1): x_n·we_node + b_edge
    # (The reference's X_L = W2(X_L) is dead — overwritten before use — so not computed.)

    # ---- 2) node-pair attention (split-weight), dense masked adjacency --------------
    s_dst = _nt(wn_dst, xn)                                        # (1, N): x_n·wn_dst
    a_dense = a_mask * jax.nn.sigmoid(s_src_b + s_dst)             # (N, N)

    # ---- 3) v2e weights produced directly in (E, N) orientation: (A @ H)^T ----------
    w_v2e = _nt(ht, a_dense)                                       # (E, N)

    # ---- 4) per-hyperedge sparse softmax (pattern H^T) + weighted sum of x_n --------
    p_v2e = _masked_softmax(w_v2e, ht)                             # (E, N)
    x_l = jnp.dot(p_v2e, xn, preferred_element_type=f32)           # (E, CP)

    # ---- 5) edge-pair attention (split-weight form) ----------------------------------
    t_edge = _nt(we_edge, x_l)                                     # (1, E)
    w_e2v = jax.nn.sigmoid(t_node_b + t_edge)                      # (N, E)

    # ---- 6) per-node sparse softmax (pattern H) + weighted sum of X_L ----------------
    p_e2v = _masked_softmax(w_e2v, h)                              # (N, E)
    x_agg = jnp.dot(p_e2v, x_l, preferred_element_type=f32)        # (N, CP)

    # ---- 7) residual (+ ReLU + BatchNorm1d with batch statistics) --------------------
    y = x_agg + x
    if not is_last:
        y = jnp.maximum(y, 0.0)
        mean = jnp.mean(y, axis=0, keepdims=True)
        var = jnp.mean((y - mean) * (y - mean), axis=0, keepdims=True)
        y = (y - mean) * jax.lax.rsqrt(var + 1e-5) * gamma + beta
        # TODO(synk): Dropout omitted (eval-mode identity); running stats not updated.
    xout_ref[...] = y
    xlout_ref[...] = x_l


def _pad_cols(m, width):
    return jnp.pad(m, ((0, 0), (0, width - m.shape[1])))


def _pack_weight_slab(params, c: int, cp: int):
    """One (CP+6, CP) f32 slab: [W1_aug; b_aug; wn_dst; we_edge; gamma; beta; feat_mask]."""
    f32 = jnp.float32
    w1 = params["W1"].astype(f32)                     # (C, C), stored (Cin, Cout)
    b1 = params["b1"].reshape(c).astype(f32)          # (C,)
    wn = params["w_node"].reshape(2 * c).astype(f32)
    we = params["w_edge"].reshape(2 * c).astype(f32)
    wn_src, wn_dst = wn[:c], wn[c:]
    we_node, we_edge = we[:c], we[c:]
    b_node = params["b_node"].reshape(()).astype(f32)
    b_edge = params["b_edge"].reshape(()).astype(f32)

    # Folded columns: (x@W1_aug)[:, C]   = x@W1·wn_src,  bias = b1·wn_src + b_node
    #                 (x@W1_aug)[:, C+1] = x@W1·we_node, bias = b1·we_node + b_edge
    col_src = w1 @ wn_src                              # (C,)
    col_tn = w1 @ we_node                              # (C,)
    w1_core = jnp.concatenate([w1, col_src[:, None], col_tn[:, None]], axis=1)  # (C, C+2)
    w1_aug = jnp.zeros((cp, cp), f32).at[:c, :c + 2].set(w1_core)

    b_core = jnp.concatenate(
        [b1, (jnp.dot(b1, wn_src) + b_node)[None], (jnp.dot(b1, we_node) + b_edge)[None]])

    def row(v):
        return jnp.zeros((1, cp), f32).at[0, :v.shape[0]].set(v)

    slab = jnp.concatenate([
        w1_aug,
        row(b_core),
        row(wn_dst),
        row(we_edge),
        row(params["gamma"].reshape(c).astype(f32)),
        row(params["beta"].reshape(c).astype(f32)),
        jnp.zeros((1, cp), f32).at[0, :c].set(1.0),    # feature mask
    ], axis=0)                                         # (CP+6, CP)
    return slab


def _pack_structure_slab(A_edge_index, H, n: int, e: int):
    """One (2N+E, max(N,E)) f32 slab: [a_mask; H; H^T].  Constant per graph structure."""
    f32 = jnp.float32
    width = max(n, e)
    a_src = A_edge_index[0].astype(jnp.int32)
    a_dst = A_edge_index[1].astype(jnp.int32)
    a_mask = jnp.zeros((n, n), f32).at[a_src, a_dst].set(1.0)      # duplicates -> 1
    h = H.astype(f32)
    return jnp.concatenate(
        [_pad_cols(a_mask, width), _pad_cols(h, width), _pad_cols(h.T, width)], axis=0)


def han_conv_forward(params, x, H_edge_index, A_edge_index, H, A_shape, X_L,
                     is_last=False):
    # H_edge_index / X_L / A_shape are kept for interface parity with the torch module:
    #   - the structure in H_edge_index is already carried by dense H,
    #   - X_L only feeds the dead W2 projection (overwritten before use),
    #   - A_shape == (N, N) with N = x.shape[0].
    del H_edge_index, X_L, A_shape
    N, C = x.shape
    E = H.shape[1]
    CP = ((C + 2 + 127) // 128) * 128                 # lane-dense feature width (>= C+2)

    # Host-side packing (in production: weight slab once per layer, structure slab once
    # per graph — both are constant across forwards and reusable device arrays).
    wslab = _pack_weight_slab(params, C, CP)          # (CP+6, CP)
    struct = _pack_structure_slab(A_edge_index, H, N, E)   # (2N+E, max(N,E))
    x_pad = jnp.pad(x.astype(jnp.float32), ((0, 0), (0, CP - C)))  # (N, CP)

    kernel = functools.partial(_han_fused_kernel, n=N, e=E, c=C, cp=CP, is_last=is_last)
    x_out_p, xl_out_p = pl.pallas_call(
        kernel,
        out_shape=(jax.ShapeDtypeStruct((N, CP), jnp.float32),
                   jax.ShapeDtypeStruct((E, CP), jnp.float32)),
        in_specs=[VMEM_SPEC, VMEM_SPEC, VMEM_SPEC],
        out_specs=(VMEM_SPEC, VMEM_SPEC),
    )(x_pad, wslab, struct)
    # Strip lane padding back to the logical feature width.
    return x_out_p[:, :C], xl_out_p[:, :C]


# ------------------------------------------------------------------------ main -----
if __name__ == "__main__":
    N, E, C = 16, 8, 32          # nodes, hyperedges, in_channels == out_channels

    key = jax.random.PRNGKey(0)
    ks = jax.random.split(key, 10)

    # Deterministic parameter init (shapes follow the torch module; dense weights stored
    # pre-transposed as (Cin, Cout) for the kernel).
    params = {
        "W1": 0.1 * jax.random.normal(ks[0], (C, C), jnp.float32),
        "b1": 0.1 * jax.random.normal(ks[1], (1, C), jnp.float32),
        # W2/b2 kept for parity with the torch module; the W2 projection result is dead
        # in the reference forward and therefore never computed here.
        "W2": 0.1 * jax.random.normal(ks[2], (C, C), jnp.float32),
        "b2": 0.1 * jax.random.normal(ks[3], (1, C), jnp.float32),
        "w_node": 0.1 * jax.random.normal(ks[4], (2 * C, 1), jnp.float32),
        "b_node": 0.1 * jax.random.normal(ks[5], (1, 1), jnp.float32),
        "w_edge": 0.1 * jax.random.normal(ks[6], (2 * C, 1), jnp.float32),
        "b_edge": 0.1 * jax.random.normal(ks[7], (1, 1), jnp.float32),
        "gamma": jnp.ones((1, C), jnp.float32),   # BatchNorm1d default weight
        "beta": jnp.zeros((1, C), jnp.float32),   # BatchNorm1d default bias
    }

    # Inputs
    x = jax.random.normal(ks[8], (N, C), jnp.float32)
    X_L = jax.random.normal(ks[9], (E, C), jnp.float32)

    nodes = jnp.arange(N)
    # node-node graph edges (unique pairs)
    A_src = jnp.concatenate([nodes, nodes])
    A_dst = jnp.concatenate([(nodes + 1) % N, (nodes + 3) % N])
    A_edge_index = jnp.stack([A_src, A_dst])                 # (2, 32)

    # hypergraph incidence: node i in hyperedges {i % E, (3i+1) % E} (always distinct;
    # every hyperedge and every node has >= 1 incidence)
    H_node = jnp.concatenate([nodes, nodes])
    H_edge = jnp.concatenate([nodes % E, (3 * nodes + 1) % E])
    H_edge_index = jnp.stack([H_node, H_edge])               # (2, 32)
    H = jnp.zeros((N, E), jnp.float32).at[H_node, H_edge].set(1.0)

    fwd = jax.jit(han_conv_forward, static_argnames=("A_shape", "is_last"))
    x_out, X_L_out = fwd(params, x, H_edge_index, A_edge_index, H,
                         A_shape=(N, N), X_L=X_L, is_last=False)
    jax.block_until_ready((x_out, X_L_out))
    assert x_out.shape == (N, C) and X_L_out.shape == (E, C)
    assert bool(jnp.all(jnp.isfinite(x_out))) and bool(jnp.all(jnp.isfinite(X_L_out)))
    print("KERNEL_OK")
</pallas_src>

<mosaic_0001>
module attributes {stable_mosaic.version = 11 : i64} {
  func.func @_han_fused_kernel(%arg0: memref<16x128xf32, #tpu.memory_space<vmem>>, %arg1: memref<134x128xf32, #tpu.memory_space<vmem>>, %arg2: memref<40x16xf32, #tpu.memory_space<vmem>>, %arg3: memref<16x128xf32, #tpu.memory_space<vmem>>, %arg4: memref<8x128xf32, #tpu.memory_space<vmem>>) attributes {dimension_semantics = [], scalar_prefetch = 0 : i64, scratch_operands = 0 : i64, tpu.core_type = #tpu.core_type<tc>} {
    %c0 = arith.constant 0 : index
    %c0_0 = arith.constant 0 : index
    %0 = vector.load %arg0[%c0, %c0_0] : memref<16x128xf32, #tpu.memory_space<vmem>>, vector<16x128xf32>
    %c0_1 = arith.constant 0 : index
    %c0_2 = arith.constant 0 : index
    %1 = vector.load %arg1[%c0_1, %c0_2] : memref<134x128xf32, #tpu.memory_space<vmem>>, vector<128x128xf32>
    %c128 = arith.constant 128 : index
    %c0_3 = arith.constant 0 : index
    %2 = vector.load %arg1[%c128, %c0_3] : memref<134x128xf32, #tpu.memory_space<vmem>>, vector<1x128xf32>
    %c129 = arith.constant 129 : index
    %c0_4 = arith.constant 0 : index
    %3 = vector.load %arg1[%c129, %c0_4] : memref<134x128xf32, #tpu.memory_space<vmem>>, vector<1x128xf32>
    %c130 = arith.constant 130 : index
    %c0_5 = arith.constant 0 : index
    %4 = vector.load %arg1[%c130, %c0_5] : memref<134x128xf32, #tpu.memory_space<vmem>>, vector<1x128xf32>
    %c131 = arith.constant 131 : index
    %c0_6 = arith.constant 0 : index
    %5 = vector.load %arg1[%c131, %c0_6] : memref<134x128xf32, #tpu.memory_space<vmem>>, vector<1x128xf32>
    %c132 = arith.constant 132 : index
    %c0_7 = arith.constant 0 : index
    %6 = vector.load %arg1[%c132, %c0_7] : memref<134x128xf32, #tpu.memory_space<vmem>>, vector<1x128xf32>
    %c133 = arith.constant 133 : index
    %c0_8 = arith.constant 0 : index
    %7 = vector.load %arg1[%c133, %c0_8] : memref<134x128xf32, #tpu.memory_space<vmem>>, vector<1x128xf32>
    %c0_9 = arith.constant 0 : index
    %c0_10 = arith.constant 0 : index
    %8 = vector.load %arg2[%c0_9, %c0_10] : memref<40x16xf32, #tpu.memory_space<vmem>>, vector<16x16xf32>
    %c16 = arith.constant 16 : index
    %c0_11 = arith.constant 0 : index
    %9 = vector.load %arg2[%c16, %c0_11] : memref<40x16xf32, #tpu.memory_space<vmem>>, vector<16x8xf32>
    %c32 = arith.constant 32 : index
    %c0_12 = arith.constant 0 : index
    %10 = vector.load %arg2[%c32, %c0_12] : memref<40x16xf32, #tpu.memory_space<vmem>>, vector<8x16xf32>
    %cst = arith.constant dense<0.000000e+00> : vector<16x128xf32>
    %11 = tpu.matmul %0, %1, %cst {dimension_numbers = #tpu.dot_dimension_numbers<[1], [0], [0], [1], [0, 0, 1, 1], [], []>} : vector<16x128xf32>, vector<128x128xf32>, vector<16x128xf32> -> vector<16x128xf32>
    %12 = vector.broadcast %2 : vector<1x128xf32> to vector<16x128xf32>
    %13 = arith.addf %11, %12 : vector<16x128xf32>
    %14 = vector.broadcast %7 : vector<1x128xf32> to vector<16x128xf32>
    %15 = arith.mulf %13, %14 : vector<16x128xf32>
    %16 = vector.extract_strided_slice %13 {offsets = [0, 32], sizes = [16, 1], strides = [1, 1]} : vector<16x128xf32> to vector<16x1xf32>
    %17 = vector.extract_strided_slice %13 {offsets = [0, 33], sizes = [16, 1], strides = [1, 1]} : vector<16x128xf32> to vector<16x1xf32>
    %cst_13 = arith.constant dense<0.000000e+00> : vector<1x16xf32>
    %18 = tpu.matmul %3, %15, %cst_13 {dimension_numbers = #tpu.dot_dimension_numbers<[1], [1], [0], [0], [0, 0, 1, 0], [], []>} : vector<1x128xf32>, vector<16x128xf32>, vector<1x16xf32> -> vector<1x16xf32>
    %19 = vector.broadcast %16 : vector<16x1xf32> to vector<16x16xf32>
    %20 = vector.broadcast %18 : vector<1x16xf32> to vector<16x16xf32>
    %21 = arith.addf %19, %20 : vector<16x16xf32>
    %22 = arith.negf %21 : vector<16x16xf32>
    %23 = math.exp %22 : vector<16x16xf32>
    %cst_14 = arith.constant 1.000000e+00 : f32
    %24 = vector.broadcast %cst_14 : f32 to vector<16x16xf32>
    %25 = arith.addf %24, %23 : vector<16x16xf32>
    %26 = arith.divf %24, %25 : vector<16x16xf32>
    %27 = arith.mulf %8, %26 : vector<16x16xf32>
    %cst_15 = arith.constant dense<0.000000e+00> : vector<8x16xf32>
    %28 = tpu.matmul %10, %27, %cst_15 {dimension_numbers = #tpu.dot_dimension_numbers<[1], [1], [0], [0], [0, 0, 1, 0], [], []>} : vector<8x16xf32>, vector<16x16xf32>, vector<8x16xf32> -> vector<8x16xf32>
    %cst_16 = arith.constant 0.000000e+00 : f32
    %29 = vector.broadcast %cst_16 : f32 to vector<8x16xf32>
    %30 = arith.cmpf ogt, %10, %29 : vector<8x16xf32>
    %cst_17 = arith.constant -1.000000e+30 : f32
    %31 = vector.broadcast %cst_17 : f32 to vector<8x16xf32>
    %32 = arith.select %30, %28, %31 : vector<8x16xi1>, vector<8x16xf32>
    %cst_18 = arith.constant dense<0xFF800000> : vector<8xf32>
    %33 = vector.multi_reduction <maximumf>, %32, %cst_18 [1] : vector<8x16xf32> to vector<8xf32>
    %34 = vector.shape_cast %33 : vector<8xf32> to vector<8x1xf32>
    %35 = vector.broadcast %34 : vector<8x1xf32> to vector<8x16xf32>
    %36 = arith.subf %32, %35 : vector<8x16xf32>
    %37 = math.exp %36 : vector<8x16xf32>
    %38 = arith.mulf %37, %10 : vector<8x16xf32>
    %cst_19 = arith.constant dense<0.000000e+00> : vector<8xf32>
    %39 = vector.multi_reduction <add>, %38, %cst_19 [1] : vector<8x16xf32> to vector<8xf32>
    %40 = vector.shape_cast %39 : vector<8xf32> to vector<8x1xf32>
    %cst_20 = arith.constant 1.000000e-30 : f32
    %41 = vector.broadcast %cst_20 : f32 to vector<8x1xf32>
    %42 = arith.maximumf %40, %41 : vector<8x1xf32>
    %43 = tpu.reciprocal %42 {approx = true} : vector<8x1xf32> -> vector<8x1xf32>
    %44 = vector.broadcast %43 : vector<8x1xf32> to vector<8x16xf32>
    %45 = arith.mulf %38, %44 : vector<8x16xf32>
    %cst_21 = arith.constant dense<0.000000e+00> : vector<8x128xf32>
    %46 = tpu.matmul %45, %15, %cst_21 {dimension_numbers = #tpu.dot_dimension_numbers<[1], [0], [0], [1], [0, 0, 1, 1], [], []>} : vector<8x16xf32>, vector<16x128xf32>, vector<8x128xf32> -> vector<8x128xf32>
    %cst_22 = arith.constant dense<0.000000e+00> : vector<1x8xf32>
    %47 = tpu.matmul %4, %46, %cst_22 {dimension_numbers = #tpu.dot_dimension_numbers<[1], [1], [0], [0], [0, 0, 1, 0], [], []>} : vector<1x128xf32>, vector<8x128xf32>, vector<1x8xf32> -> vector<1x8xf32>
    %48 = vector.broadcast %17 : vector<16x1xf32> to vector<16x8xf32>
    %49 = vector.broadcast %47 : vector<1x8xf32> to vector<16x8xf32>
    %50 = arith.addf %48, %49 : vector<16x8xf32>
    %51 = arith.negf %50 : vector<16x8xf32>
    %52 = math.exp %51 : vector<16x8xf32>
    %cst_23 = arith.constant 1.000000e+00 : f32
    %53 = vector.broadcast %cst_23 : f32 to vector<16x8xf32>
    %54 = arith.addf %53, %52 : vector<16x8xf32>
    %55 = arith.divf %53, %54 : vector<16x8xf32>
    %cst_24 = arith.constant 0.000000e+00 : f32
    %56 = vector.broadcast %cst_24 : f32 to vector<16x8xf32>
    %57 = arith.cmpf ogt, %9, %56 : vector<16x8xf32>
    %cst_25 = arith.constant -1.000000e+30 : f32
    %58 = vector.broadcast %cst_25 : f32 to vector<16x8xf32>
    %59 = arith.select %57, %55, %58 : vector<16x8xi1>, vector<16x8xf32>
    %cst_26 = arith.constant dense<0xFF800000> : vector<16xf32>
    %60 = vector.multi_reduction <maximumf>, %59, %cst_26 [1] : vector<16x8xf32> to vector<16xf32>
    %61 = vector.shape_cast %60 : vector<16xf32> to vector<16x1xf32>
    %62 = vector.broadcast %61 : vector<16x1xf32> to vector<16x8xf32>
    %63 = arith.subf %59, %62 : vector<16x8xf32>
    %64 = math.exp %63 : vector<16x8xf32>
    %65 = arith.mulf %64, %9 : vector<16x8xf32>
    %cst_27 = arith.constant dense<0.000000e+00> : vector<16xf32>
    %66 = vector.multi_reduction <add>, %65, %cst_27 [1] : vector<16x8xf32> to vector<16xf32>
    %67 = vector.shape_cast %66 : vector<16xf32> to vector<16x1xf32>
    %cst_28 = arith.constant 1.000000e-30 : f32
    %68 = vector.broadcast %cst_28 : f32 to vector<16x1xf32>
    %69 = arith.maximumf %67, %68 : vector<16x1xf32>
    %70 = tpu.reciprocal %69 {approx = true} : vector<16x1xf32> -> vector<16x1xf32>
    %71 = vector.broadcast %70 : vector<16x1xf32> to vector<16x8xf32>
    %72 = arith.mulf %65, %71 : vector<16x8xf32>
    %cst_29 = arith.constant dense<0.000000e+00> : vector<16x128xf32>
    %73 = tpu.matmul %72, %46, %cst_29 {dimension_numbers = #tpu.dot_dimension_numbers<[1], [0], [0], [1], [0, 0, 1, 1], [], []>} : vector<16x8xf32>, vector<8x128xf32>, vector<16x128xf32> -> vector<16x128xf32>
    %74 = arith.addf %73, %0 : vector<16x128xf32>
    %cst_30 = arith.constant 0.000000e+00 : f32
    %75 = vector.broadcast %cst_30 : f32 to vector<16x128xf32>
    %76 = arith.maximumf %74, %75 : vector<16x128xf32>
    %cst_31 = arith.constant dense<0.000000e+00> : vector<128xf32>
    %77 = vector.multi_reduction <add>, %76, %cst_31 [0] : vector<16x128xf32> to vector<128xf32>
    %78 = vector.shape_cast %77 : vector<128xf32> to vector<1x128xf32>
    %cst_32 = arith.constant 1.600000e+01 : f32
    %79 = vector.broadcast %cst_32 : f32 to vector<1x128xf32>
    %80 = arith.divf %78, %79 : vector<1x128xf32>
    %81 = vector.broadcast %80 : vector<1x128xf32> to vector<16x128xf32>
    %82 = arith.subf %76, %81 : vector<16x128xf32>
    %83 = vector.broadcast %80 : vector<1x128xf32> to vector<16x128xf32>
    %84 = arith.subf %76, %83 : vector<16x128xf32>
    %85 = arith.mulf %82, %84 : vector<16x128xf32>
    %cst_33 = arith.constant dense<0.000000e+00> : vector<128xf32>
    %86 = vector.multi_reduction <add>, %85, %cst_33 [0] : vector<16x128xf32> to vector<128xf32>
    %87 = vector.shape_cast %86 : vector<128xf32> to vector<1x128xf32>
    %cst_34 = arith.constant 1.600000e+01 : f32
    %88 = vector.broadcast %cst_34 : f32 to vector<1x128xf32>
    %89 = arith.divf %87, %88 : vector<1x128xf32>
    %90 = vector.broadcast %80 : vector<1x128xf32> to vector<16x128xf32>
    %91 = arith.subf %76, %90 : vector<16x128xf32>
    %cst_35 = arith.constant 9.99999974E-6 : f32
    %92 = vector.broadcast %cst_35 : f32 to vector<1x128xf32>
    %93 = arith.addf %89, %92 : vector<1x128xf32>
    %94 = math.rsqrt %93 : vector<1x128xf32>
    %95 = vector.broadcast %94 : vector<1x128xf32> to vector<16x128xf32>
    %96 = arith.mulf %91, %95 : vector<16x128xf32>
    %97 = vector.broadcast %5 : vector<1x128xf32> to vector<16x128xf32>
    %98 = arith.mulf %96, %97 : vector<16x128xf32>
    %99 = vector.broadcast %6 : vector<1x128xf32> to vector<16x128xf32>
    %100 = arith.addf %98, %99 : vector<16x128xf32>
    %c0_36 = arith.constant 0 : index
    %c0_37 = arith.constant 0 : index
    %101 = vector.load %arg3[%c0_36, %c0_37] : memref<16x128xf32, #tpu.memory_space<vmem>>, vector<16x128xf32>
    tpu.vector_store %arg3[%c0_36, %c0_37], %100 {strides = array<i32>} : memref<16x128xf32, #tpu.memory_space<vmem>>, vector<16x128xf32>,
    %c0_38 = arith.constant 0 : index
    %c0_39 = arith.constant 0 : index
    %102 = vector.load %arg4[%c0_38, %c0_39] : memref<8x128xf32, #tpu.memory_space<vmem>>, vector<8x128xf32>
    tpu.vector_store %arg4[%c0_38, %c0_39], %46 {strides = array<i32>} : memref<8x128xf32, #tpu.memory_space<vmem>>, vector<8x128xf32>,
    return
  }
}

</mosaic_0001>

<bundles_post_ra>
// kernel: han_conv_forward.1
= control target key start
LH: loop header
LB: loop body
LE: loop exit
PB: predicated region body
PF: predicated region fallthrough
CT: control target
= control target key end

     0   :  { %10 = vsyncpa [#allocation3], 0  ;;  %s1046_s0 = inlined_call_operand.vmem [shape: f32[16,128], index: 0, kind: input, shape index: {}]   ;;  %s1047_s1 = inlined_call_operand.vmem [shape: f32[134,128], index: 1, kind: input, shape index: {}]   ;;  %s1048_s2 = inlined_call_operand.vmem [shape: f32[40,16], index: 2, kind: input, shape index: {}]   ;;  %s1049_s3 = inlined_call_operand.hbm [shape: f32[16,128], index: 3, kind: output, shape index: {0}]   ;;  %s1050_s4 = inlined_call_operand.hbm [shape: f32[8,128], index: 4, kind: output, shape index: {1}]  }
   0x1   :  { %v35_v0 = vld [vmem:[%s1047_s1 + $0x78] sm:$0xff]  ;;  %v34_v1 = vld [vmem:[%s1047_s1 + $0x70] sm:$0xff]  ;;  %v33_v2 = vld [vmem:[%s1047_s1 + $0x68] sm:$0xff] }
   0x2   :  { %726 = vmatprep.subr.mxu0 %v35_v0  ;;  %v32_v3 = vld [vmem:[%s1047_s1 + $0x60] sm:$0xff] }
   0x3   :  { %727 = vmatpush3.msra.mxu0 %v35_v0 }
   0x4   :  { %728 = vmatprep.subr.mxu0 %v34_v1 }
   0x5   :  { %729 = vmatpush3.msra.mxu0 %v34_v1 }
   0x6   :  { %730 = vmatprep.subr.mxu0 %v33_v2 }
   0x7   :  { %11 = vsyncpa [#allocation5], 0  ;;  %731 = vmatpush3.msra.mxu0 %v33_v2  ;;  %v31_v4 = vld [vmem:[%s1047_s1 + $0x58] sm:$0xff]  ;;  %v30_v5 = vld [vmem:[%s1047_s1 + $0x50] sm:$0xff]  ;;  %v877_v17 = vmov 32   ;;  %v878_v18 = vmov 0.0   ;;  %v212_v29 = vlaneseq }
   0x8   :  { %732 = vmatprep.subr.mxu0 %v32_v3  ;;  %v29_v6 = vld [vmem:[%s1047_s1 + $0x48] sm:$0xff]  ;;  %v28_v7 = vld [vmem:[%s1047_s1 + $0x40] sm:$0xff]  ;;  %v27_v8 = vld [vmem:[%s1047_s1 + $0x38] sm:$0xff]  ;;  %800 = vset.pattern.permute.xlu0 %v877_v17  ;;  %vm879_vm0 = vmmov 0   ;;  %v880_v19 = vmov 33   ;;  %vm232_vm1 = vcmask 130048  }
   0x9   :  { %733 = vmatpush3.msra.mxu0 %v32_v3  ;;  %v26_v9 = vld [vmem:[%s1047_s1 + $0x30] sm:$0xff]  ;;  %v25_v10 = vld [vmem:[%s1047_s1 + $0x28] sm:$0xff]  ;;  %v24_v11 = vld [vmem:[%s1047_s1 + $0x20] sm:$0xff]  ;;  %761 = vmatprep.subr.mxu1 %v878_v18  ;;  %v984_v30 = vshrl.u32 %v212_v29, 7  ;;  %vm500_vm5 = vcmask 64512   ;;  %s881_s16 = smov [#allocation4]  }
   0xa   :  { %734 = vmatprep.subr.mxu0 %v31_v4  ;;  %v23_v12 = vld [vmem:[%s1047_s1 + $0x18] sm:$0xff]  ;;  %v22_v13 = vld [vmem:[%s1047_s1 + $0x10] sm:$0xff]  ;;  %v21_v14 = vld [vmem:[%s1047_s1 + $0x8] sm:$0xff]  ;;  %765 = vmatprep.mubr.msk.f32.mxu1 %vm879_vm0, %v878_v18  ;;  %s668_s17 = sshll.u32 %s881_s16, 4  ;;  %s669_s17 = int_to_ptr.vmem [resolvable:$true] %s668_s17 }
   0xb   :  { %735 = vmatpush3.msra.mxu0 %v31_v4  ;;  %v20_v15 = vld [vmem:[%s1047_s1] sm:$0xff]  ;;  %v961_v16 = vld [vmem:[%s1046_s0 + $0x8] sm:$0xff]  ;;  %802 = vset.pattern.permute.xlu1 %v880_v19  ;;  %v214_v32 = vsub.s32 0, %v984_v30  ;;  %s833_s18 = scalar_lea.vmem %s669_s17, 128  ;;  %p838_p1 = scmp.lt.s32.totalorder %s669_s17, %s669_s17 }
   0xc   :  { %736 = vmatprep.subr.mxu0 %v30_v5  ;;  %v680_v20 = vld [vmem:[%s1047_s1 + $0x80] ss:$0 sm:$0xff]  ;;  %v681_v22 = vld [vmem:[%s1047_s1 + $0x85] ss:$0 sm:$0xff]  ;;  %v37_v28 = vld [vmem:[%s1047_s1 + $0x81] sm:$0x1]  ;;  %p834_p0 = scmp.ne.s32.totalorder %s669_s17, %s833_s18  ;;  %p839_p2 = scmp.lt.s32.totalorder %s833_s18, %s833_s18 }
   0xd   :  { %737 = vmatpush3.msra.mxu0 %v30_v5  ;;  %v43_v45 = vld [vmem:[%s1048_s2 + $0x8] sm:$0xff]  ;;  %v42_v49 = vld [vmem:[%s1048_s2] sm:$0xff] }
   0xe   :  { %738 = vmatprep.subr.mxu0 %v29_v6  ;;  %v46_v51 = vld [vmem:[%s1048_s2 + $0x20] sm:$0xff]  ;;  %p840_p3 = por %p839_p2, %p838_p1 }
   0xf   :  { %739 = vmatpush3.msra.mxu0 %v29_v6  ;;  %vm312_vm2 = vcmp.gt.f32.partialorder %v46_v51, 0.0  ;;  %v38_v3 = vld [vmem:[%s1047_s1 + $0x82] sm:$0x1] }
  0x10   :  { %740 = vmatprep.subr.mxu0 %v28_v7  ;;  %p841_p4 = pnand %p840_p3, %p834_p0 }
  0x11   :  { %741 = vmatpush3.msra.mxu0 %v28_v7 }
  0x12   :  { %742 = vmatprep.subr.mxu0 %v27_v8 }
  0x13   :  { %743 = vmatpush3.msra.mxu0 %v27_v8 }
  0x14   :  { %744 = vmatprep.subr.mxu0 %v26_v9 }
  0x15   :  { %745 = vmatpush3.msra.mxu0 %v26_v9 }
  0x16   :  { %746 = vmatprep.subr.mxu0 %v25_v10 }
  0x17   :  { %747 = vmatpush3.msra.mxu0 %v25_v10 }
  0x18   :  { %748 = vmatprep.subr.mxu0 %v24_v11 }
  0x19   :  { %749 = vmatpush3.msra.mxu0 %v24_v11 }
  0x1a   :  { %750 = vmatprep.subr.mxu0 %v23_v12 }
  0x1b   :  { %751 = vmatpush3.msra.mxu0 %v23_v12 }
  0x1c   :  { %752 = vmatprep.subr.mxu0 %v22_v13 }
  0x1d   :  { %753 = vmatpush3.msra.mxu0 %v22_v13 }
  0x1e   :  { %754 = vmatprep.subr.mxu0 %v21_v14 }
  0x1f   :  { %755 = vmatpush3.msra.mxu0 %v21_v14 }
  0x20   :  { %756 = vmatprep.subr.mxu0 %v20_v15 }
  0x21   :  { %757 = vmatpush3.msra.mxu0 %v20_v15 }
  0x22   :  { %759 = vmatmul.mubr.f32.vlgmr.msra.gmra.mxu0 %v961_v16 }
  0xe2   :  { %v760_v21 = vpop.f32.mrf.mxu0 }
  0xe3   :  { %v973_v23 = vadd.f32 %v760_v21, %v680_v20 }
  0xe4   :  { %v117_v24 = vpop.f32.mrf.mxu0 }
  0xe5   :  { %v118_v25 = vadd.f32 %v680_v20, %v117_v24  ;;  %209 = vperm.xlu0 %800, %v973_v23   ;;  %v131_v26 = vmul.f32 %v681_v22, %v973_v23  ;;  %v45_v20 = vld [vmem:[%s1048_s2 + $0x18] sm:$0xff] }
  0xe6   :  { %vm497_vm4 = vcmp.gt.f32.partialorder %v45_v20, 0.0 }
  0xe7   :  { %762 = vmatpush3.xpose.msra.mxu1 %v131_v26  ;;  %v130_v27 = vmul.f32 %v681_v22, %v118_v25 }
  0xe8   :  { %763 = vmatprep.subr.mxu1 %v878_v18 }
  0xe9   :  { %204 = vperm.xlu0 %800, %v118_v25  }
  0xeb   :  { %764 = vmatpush3.xpose.msra.mxu1 %v130_v27 }
  0xec   :  { %768 = vmatprep.subr.mxu1 %v878_v18 }
  0xed   :  { %801 = vset.pattern.permute.xlu0 %v880_v19  ;;  %v44_v19 = vld [vmem:[%s1048_s2 + $0x10] sm:$0xff] }
  0xee   :  { %471 = vperm.xlu0 %801, %v118_v25   ;;  %766 = vmatmul.mubr.f32.vlgmr.msra.gmra.mxu1 %v37_v28  ;;  %vm496_vm3 = vcmp.gt.f32.partialorder %v44_v19, 0.0 }
  0xef   :  { %772 = vmatprep.mubr.msk.f32.mxu1 %vm879_vm0, %v878_v18 }
 0x160   :  { %v210_v31 = vpop.permute.xlu0 %209 }
 0x164   :  { %v205_v35 = vpop.permute.xlu0 %204 }
 0x169   :  { %v472_v6 = vpop.permute.xlu0 %471 }
 0x1ae   :  { %v198_v33 = vpop.f32.mrf.mxu1 }
 0x1af   :  { %v215_v34 = vrot.slane %v198_v33, %v214_v32 }
 0x1b0   :  { %v767_v36 = vpop.f32.mrf.mxu1 }
 0x1b1   :  { %v216_v37 = vadd.f32 %v215_v34, %v205_v35  ;;  %v217_v38 = vadd.f32 %v215_v34, %v210_v31 }
 0x1b3   :  { %v682_v39 = vmul.f32 -1.442695, %v216_v37  ;;  %v683_v40 = vmul.f32 -1.442695, %v217_v38 }
 0x1b5   :  { %803 = vpow2.f32 %v682_v39 }
 0x1b6   :  { %805 = vpow2.f32 %v683_v40 }
 0x1c2   :  { %v804_v41 = vpop.eup %803 }
 0x1c3   :  { %v806_v42 = vpop.eup %805  ;;  %v224_v43 = vadd.f32 1.0, %v804_v41 }
 0x1c4   :  { %v225_v44 = vadd.f32 1.0, %v806_v42 }
 0x1c6   :  { %807 = vrcp.f32 %v225_v44 }
 0x1c7   :  { %809 = vrcp.f32 %v224_v43 }
 0x1d3   :  { %v808_v46 = vpop.eup %807 }
 0x1d4   :  { %v231_v47 = vmul.f32 %v808_v46, %v43_v45  ;;  %v810_v48 = vpop.eup %809 }
 0x1d5   :  { %v230_v50 = vmul.f32 %v810_v48, %v42_v49 }
 0x1d6   :  { %769 = vmatpush3.xpose.msk.msra.mxu1 %vm232_vm1, %v231_v47  ;;  %v18_v47 = vld [vmem:[%s1046_s0] sm:$0xff] }
 0x1d7   :  { %770 = vmatprep.subr.mxu1 %v878_v18  ;;  %758 = vmatprep.mubr.f32.mxu0 %v18_v47 }
 0x1da   :  { %771 = vmatpush3.xpose.msk.msra.mxu1 %vm232_vm1, %v230_v50 }
 0x1db   :  { %775 = vmatprep.subr.mxu1 %v878_v18 }
 0x1dd   :  { %773 = vmatmul.mubr.msk.f32.vlgmr.msra.gmra.mxu1 %vm232_vm1, %v46_v51 }
 0x1de   :  { %776 = vmatpush3.msra.mxu1 %v131_v26  ;;  %779 = vmatprep.mubr.msk.f32.mxu1 %vm879_vm0, %v878_v18 }
 0x1df   :  { %777 = vmatprep.subr.mxu1 %v878_v18 }
 0x1e0   :  { %778 = vmatpush3.msra.mxu1 %v130_v27 }
 0x1e1   :  { %782 = vmatprep.subr.mxu1 %v878_v18 }
 0x29d   :  { %v308_v52 = vpop.f32.mrf.mxu1 }
 0x29e   :  { %v313_v53 = vsel %vm312_vm2, %v308_v52, -1e+30 }
 0x29f   :  { %v774_v54 = vpop.f32.mrf.mxu1  ;;  %v314_v55 = vsel %vm232_vm1, %v313_v53, -inf }
 0x2a0   :  { %315 = vmax.xlane.f32.xlu1 %v314_v55 }
 0x329   :  { %v316_v56 = vpop.xlane.xlu1 %315 }
 0x32a   :  { %v317_v57 = vsub.f32 %v313_v53, %v316_v56 }
 0x32c   :  { %v318_v58 = vmul.f32 1.442695, %v317_v57 }
 0x32e   :  { %811 = vpow2.f32 %v318_v58 }
 0x33b   :  { %v812_v59 = vpop.eup %811 }
 0x33c   :  { %v320_v60 = vmul.f32 %v812_v59, %v46_v51 }
 0x33e   :  { %v321_v61 = vsel %vm232_vm1, %v320_v60, 0.0 }
 0x33f   :  { %322 = vadd.xlane.f32.xlu1 %v321_v61 }
 0x350   :  { %475 = vperm.xlu1 %802, %v973_v23  }
 0x3c8   :  { %v323_v62 = vpop.xlane.xlu1 %322 }
 0x3c9   :  { %v324_v63 = vmax.f32 %v323_v62, 1e-30 }
 0x3cb   :  { %813 = vrcp.f32 %v324_v63 }
 0x3cc   :  { %v476_v8 = vpop.permute.xlu1 %475 }
 0x3d8   :  { %v814_v0 = vpop.eup %813 }
 0x3d9   :  { %v326_v1 = vmul.f32 %v814_v0, %v320_v60 }
 0x3db   :  { %780 = vmatmul.mubr.msk.f32.vlgmr.msra.gmra.mxu1 %vm232_vm1, %v326_v1 }
 0x3dc   :  { %784 = vmatprep.mubr.msk.f32.mxu1 %vm879_vm0, %v878_v18 }
 0x49b   :  { %v396_v2 = vpop.f32.mrf.mxu1 }
 0x49c   :  { %649 = vst [vmem:[#allocation4] sm:$0xff] %v396_v2  ;;  %783 = vmatpush3.xpose.msra.mxu1 %v396_v2 }
 0x49d   :  { %v781_v4 = vpop.f32.mrf.mxu1  ;;  %787 = vmatprep.subr.mxu1 %v396_v2 }
 0x49f   :  { %785 = vmatmul.mubr.f32.vlgmr.msra.gmra.mxu1 %v38_v3 }
 0x4a0   :  { %788 = vmatpush3.msra.mxu1 %v396_v2 }
 0x55f   :  { %v466_v5 = vpop.f32.mrf.mxu1 }
 0x560   :  { %v481_v7 = vrot.slane %v466_v5, %v214_v32 }
 0x561   :  { %v786_v9 = vpop.f32.mrf.mxu1 }
 0x562   :  { %v482_v10 = vadd.f32 %v481_v7, %v472_v6  ;;  %v483_v11 = vadd.f32 %v481_v7, %v476_v8 }
 0x564   :  { %v688_v12 = vmul.f32 -1.442695, %v482_v10  ;;  %v689_v13 = vmul.f32 -1.442695, %v483_v11 }
 0x566   :  { %815 = vpow2.f32 %v688_v12 }
 0x567   :  { %817 = vpow2.f32 %v689_v13 }
 0x573   :  { %v816_v14 = vpop.eup %815 }
 0x574   :  { %v818_v15 = vpop.eup %817  ;;  %v490_v17 = vadd.f32 1.0, %v816_v14 }
 0x575   :  { %v491_v18 = vadd.f32 1.0, %v818_v15 }
 0x576   :  { %819 = vrcp.f32 %v490_v17 }
 0x577   :  { %821 = vrcp.f32 %v491_v18 }
 0x583   :  { %v820_v21 = vpop.eup %819 }
 0x584   :  { %v822_v22 = vpop.eup %821  ;;  %v498_v23 = vsel %vm496_vm3, %v820_v21, -1e+30 }
 0x585   :  { %v499_v24 = vsel %vm497_vm4, %v822_v22, -1e+30  ;;  %v501_v25 = vsel %vm500_vm5, %v498_v23, -inf }
 0x586   :  { %v504_v26 = vsel %vm500_vm5, %v499_v24, -inf  ;;  %502 = vmax.xlane.f32.xlu0 %v501_v25 }
 0x587   :  { %505 = vmax.xlane.f32.xlu1 %v504_v26 }
 0x60f   :  { %v503_v27 = vpop.xlane.xlu0 %502 }
 0x610   :  { %v506_v28 = vpop.xlane.xlu1 %505  ;;  %v507_v29 = vsub.f32 %v498_v23, %v503_v27 }
 0x611   :  { %v508_v30 = vsub.f32 %v499_v24, %v506_v28 }
 0x612   :  { %v509_v31 = vmul.f32 1.442695, %v507_v29 }
 0x613   :  { %v511_v32 = vmul.f32 1.442695, %v508_v30 }
 0x614   :  { %823 = vpow2.f32 %v509_v31 }
 0x615   :  { %825 = vpow2.f32 %v511_v32 }
 0x621   :  { %v824_v33 = vpop.eup %823 }
 0x622   :  { %v826_v34 = vpop.eup %825  ;;  %v513_v35 = vmul.f32 %v824_v33, %v44_v19 }
 0x623   :  { %v514_v37 = vmul.f32 %v826_v34, %v45_v20 }
 0x624   :  { %v515_v36 = vsel %vm500_vm5, %v513_v35, 0.0 }
 0x625   :  { %516 = vadd.xlane.f32.xlu0 %v515_v36  ;;  %v518_v38 = vsel %vm500_vm5, %v514_v37, 0.0 }
 0x629   :  { %519 = vadd.xlane.f32.xlu0 %v518_v38 }
 0x6ae   :  { %v517_v39 = vpop.xlane.xlu0 %516 }
 0x6af   :  { %v521_v40 = vmax.f32 %v517_v39, 1e-30 }
 0x6b1   :  { %827 = vrcp.f32 %v521_v40 }
 0x6b2   :  { %v520_v41 = vpop.xlane.xlu0 %519 }
 0x6b3   :  { %v522_v42 = vmax.f32 %v520_v41, 1e-30 }
 0x6b5   :  { %829 = vrcp.f32 %v522_v42 }
 0x6be   :  { %v828_v43 = vpop.eup %827 }
 0x6bf   :  { %v525_v44 = vmul.f32 %v828_v43, %v513_v35 }
 0x6c1   :  { %789 = vmatprep.mubr.msk.f32.mxu1 %vm500_vm5, %v525_v44 }
 0x6c2   :  { %v830_v45 = vpop.eup %829 }
 0x6c3   :  { %v526_v46 = vmul.f32 %v830_v45, %v514_v37 }
 0x6c5   :  { %790 = vmatmul.mubr.msk.f32.vlgmr.msra.gmra.mxu1 %vm500_vm5, %v526_v46 }
 0x6c6   :  { %844 = shalt.err (!%p841_p4)
}
 0x6c7   :  { %671 = dma.vmem_to_hbm [thread:$0]  %s669_s17, 128, %s1050_s4, [#allocation5]   ;;  %v692_v11 = vld [vmem:[%s1047_s1 + $0x83] ss:$0 sm:$0xff]  ;;  %v693_v14 = vld [vmem:[%s1047_s1 + $0x84] ss:$0 sm:$0xff] }
 0x6c8   :  { %s882_s23 = smov [#allocation2]  }
 0x6c9   :  { %s655_s24 = sshll.u32 %s882_s23, 4  ;;  %s656_s24 = int_to_ptr.vmem [resolvable:$true] %s655_s24 }
 0x6ca   :  { %s853_s25 = scalar_lea.vmem %s656_s24, 256  ;;  %p858_p6 = scmp.lt.s32.totalorder %s656_s24, %s656_s24 }
 0x6cb   :  { %p854_p5 = scmp.ne.s32.totalorder %s656_s24, %s853_s25  ;;  %p859_p7 = scmp.lt.s32.totalorder %s853_s25, %s853_s25 }
 0x6cd   :  { %p860_p8 = por %p859_p7, %p858_p6 }
 0x6cf   :  { %p861_p9 = pnand %p860_p8, %p854_p5 }
 0x785   :  { %v791_v48 = vpop.f32.mrf.mxu1 }
 0x786   :  { %v605_v49 = vadd.f32 %v791_v48, %v961_v16 }
 0x787   :  { %v599_v50 = vpop.f32.mrf.mxu1 }
 0x788   :  { %v600_v51 = vadd.f32 %v599_v50, %v18_v47  ;;  %v609_v52 = vmax.f32 %v605_v49, 0.0 }
 0x78a   :  { %v608_v53 = vmax.f32 %v600_v51, 0.0 }
 0x78c   :  { %v610_v54 = vadd.f32 %v609_v52, %v608_v53 }
 0x78e   :  { %v611_v55 = vrot.slane %v610_v54, 4 }
 0x790   :  { %v612_v56 = vadd.f32 %v611_v55, %v610_v54 }
 0x792   :  { %v613_v57 = vrot.slane %v612_v56, 2 }
 0x794   :  { %v614_v58 = vadd.f32 %v613_v57, %v612_v56 }
 0x796   :  { %v615_v59 = vrot.slane %v614_v58, 1 }
 0x798   :  { %v616_v60 = vadd.f32 %v615_v59, %v614_v58 }
 0x79a   :  { %v618_v61 = vmul.f32 0.0625, %v616_v60 }
 0x79c   :  { %v619_v62 = vsub.f32 %v608_v53, %v618_v61  ;;  %v620_v63 = vsub.f32 %v609_v52, %v618_v61 }
 0x79e   :  { %v621_v0 = vmul.f32 %v619_v62, %v619_v62  ;;  %v622_v1 = vmul.f32 %v620_v63, %v620_v63 }
 0x7a0   :  { %v623_v2 = vadd.f32 %v622_v1, %v621_v0 }
 0x7a2   :  { %v624_v3 = vrot.slane %v623_v2, 4 }
 0x7a4   :  { %v625_v4 = vadd.f32 %v624_v3, %v623_v2 }
 0x7a6   :  { %v626_v16 = vrot.slane %v625_v4, 2 }
 0x7a8   :  { %v627_v5 = vadd.f32 %v626_v16, %v625_v4 }
 0x7aa   :  { %v628_v6 = vrot.slane %v627_v5, 1 }
 0x7ac   :  { %v629_v7 = vadd.f32 %v628_v6, %v627_v5 }
 0x7ae   :  { %v630_v8 = vmul.f32 0.0625, %v629_v7 }
 0x7b0   :  { %v631_v9 = vadd.f32 1e-05, %v630_v8 }
 0x7b2   :  { %831 = vrsqrt.f32 %v631_v9 }
 0x7bf   :  { %v832_v10 = vpop.eup %831 }
 0x7c0   :  { %v633_v12 = vmul.f32 %v832_v10, %v619_v62  ;;  %v634_v13 = vmul.f32 %v832_v10, %v620_v63 }
 0x7c2   :  { %v639_v15 = vmul.f32 %v692_v11, %v633_v12  ;;  %v640_v17 = vmul.f32 %v692_v11, %v634_v13 }
 0x7c4   :  { %v645_v18 = vadd.f32 %v693_v14, %v639_v15  ;;  %v646_v19 = vadd.f32 %v693_v14, %v640_v17 }
 0x7c6   :  { %647 = vst [vmem:[#allocation2] sm:$0xff] %v645_v18  ;;  %648 = vst [vmem:[#allocation2 + $0x8] sm:$0xff] %v646_v19 }
 0x7c7   :  { %864 = shalt.err (!%p861_p9)
}
 0x7c8   :  { %s883_s26 = smov 128   ;;  %s884_s27 = smov 8  }
 0x7c9   :  { %661 = dma.vmem_to_hbm [thread:$0]  %s656_s24, 256, %s1049_s3, [#allocation3], %s883_s26, %s883_s26, %s884_s27  }
 0x7ca   :  { %873 = dma.done.wait [#allocation3], 256  }
 0x7cb   :  { %874 = vsyncadd [#allocation3], 4294967040 }
 0x7cc   :  { %875 = dma.done.wait [#allocation5], 128  }
 0x7cd   :  { %876 = vsyncadd [#allocation5], 4294967168 }
 0x7ce   :  { %678 = vsyncpa [#allocation3], 1 }
 0x7cf   :  { %679 = vsyncpa [#allocation5], 1 }

</bundles_post_ra>
